<compile_context>
chip_gen: v5e
topology: v5e:2x2
jax: 0.10.0
libtpu: 0.0.40
codegen_flags: <defaults>
</compile_context>

<pallas_src>
import math

import jax
import jax.numpy as jnp
from jax import lax
from jax.experimental import pallas as pl
from jax.experimental.pallas import tpu as pltpu


# ------------------------------ tiling helpers ----------------------------- #

def _round_up(x, m):
    return ((x + m - 1) // m) * m


def _pick_tile(n_rows, n_cols, itemsize, target_bytes=2 << 20):
    """Pick (tile_rows, padded_rows): ~2 MiB per tile, sublane/lane friendly.

    - single tile (rows padded to a multiple of 8) when the batch is small,
    - otherwise multiple-of-128 row tiles so the lane-dense (1, TILE) output
      block satisfies the (8, 128) constraint.
    """
    rows = max(128, min(1024, target_bytes // max(1, n_cols * itemsize)))
    rows = (rows // 128) * 128
    if n_rows <= rows:
        tile = _round_up(n_rows, 8)
        return tile, tile
    return rows, _round_up(n_rows, rows)


# ----------------------------- Pallas kernels ------------------------------ #

def _log_prob_kernel(const_ref, mean_ref, inv_std_ref, z_ref, out_ref):
    """out[0, b] = const - 0.5 * sum_m ((z[b,m]-mean[m]) * inv_std[m])^2."""
    z = z_ref[...].astype(jnp.float32)                       # (TILE_B, M)
    diff = (z - mean_ref[...]) * inv_std_ref[...]            # params: (1, M) f32
    d2 = diff * diff
    # Row-sum via MXU "A @ B.T" pattern -> lane-dense (1, TILE_B) result with no
    # sublane->lane relayout and no masked (TILE_B, 1) stores. HIGHEST precision
    # keeps the f32 accumulation exact enough for 1e-5 tolerances.
    ones = jnp.ones((1, d2.shape[1]), jnp.float32)
    ssq = lax.dot_general(
        ones, d2,
        dimension_numbers=(((1,), (1,)), ((), ())),
        preferred_element_type=jnp.float32,
        precision=lax.Precision.HIGHEST,
    )                                                        # (1, TILE_B)
    out_ref[...] = const_ref[0] - 0.5 * ssq


def _sample_kernel(mean_ref, std_ref, eps_ref, out_ref):
    """Reparameterized sample: mean + std * eps."""
    eps = eps_ref[...].astype(jnp.float32)
    out_ref[...] = (mean_ref[...] + std_ref[...] * eps).astype(out_ref.dtype)


# ------------------------------ JAX wrappers ------------------------------- #

def prior_log_prob(mean, std, z):
    """Independent(Normal(mean, std), 1).log_prob(z); z: (B, M) -> (B,) f32."""
    B, M = z.shape
    tile_b, b_pad = _pick_tile(B, M, z.dtype.itemsize)
    z_p = z if b_pad == B else jnp.pad(z, ((0, b_pad - B), (0, 0)))

    std_f32 = std.astype(jnp.float32)
    mean2d = mean.reshape(1, M).astype(jnp.float32)
    inv_std2d = (1.0 / std_f32).reshape(1, M)
    # z-independent terms hoisted out of the per-element path (SMEM scalar).
    const = (-(jnp.sum(jnp.log(std_f32)) + 0.5 * M * math.log(2.0 * math.pi))
             ).reshape(1).astype(jnp.float32)

    out = pl.pallas_call(
        _log_prob_kernel,
        out_shape=jax.ShapeDtypeStruct((1, b_pad), jnp.float32),
        grid=(b_pad // tile_b,),
        in_specs=[
            pl.BlockSpec(memory_space=pltpu.MemorySpace.SMEM),   # const scalar
            pl.BlockSpec((1, M), lambda i: (0, 0)),              # mean (resident)
            pl.BlockSpec((1, M), lambda i: (0, 0)),              # 1/std (resident)
            pl.BlockSpec((tile_b, M), lambda i: (i, 0)),         # z tiles
        ],
        out_specs=pl.BlockSpec((1, tile_b), lambda i: (0, i)),   # lane-dense
        compiler_params=pltpu.CompilerParams(
            dimension_semantics=("parallel",)),
    )(const, mean2d, inv_std2d, z_p)
    return out[0, :B]


def prior_sample(mean, std, eps):
    """Reparameterized sample mean + std * eps; eps: (S, M) -> (S, M)."""
    S, M = eps.shape
    tile_s, s_pad = _pick_tile(S, M, eps.dtype.itemsize)
    eps_p = eps if s_pad == S else jnp.pad(eps, ((0, s_pad - S), (0, 0)))

    mean2d = mean.reshape(1, M).astype(jnp.float32)
    std2d = std.reshape(1, M).astype(jnp.float32)

    # NOTE: input_output_aliases={2: 0} would drop the output HBM allocation but
    # donates the caller's eps buffer; omitted so eps stays usable after sampling.
    out = pl.pallas_call(
        _sample_kernel,
        out_shape=jax.ShapeDtypeStruct((s_pad, M), eps.dtype),
        grid=(s_pad // tile_s,),
        in_specs=[
            pl.BlockSpec((1, M), lambda i: (0, 0)),              # mean (resident)
            pl.BlockSpec((1, M), lambda i: (0, 0)),              # std (resident)
            pl.BlockSpec((tile_s, M), lambda i: (i, 0)),         # eps tiles
        ],
        out_specs=pl.BlockSpec((tile_s, M), lambda i: (i, 0)),
        compiler_params=pltpu.CompilerParams(
            dimension_semantics=("parallel",)),
    )(mean2d, std2d, eps_p)
    return out[:S]


# ------------------------------- module port ------------------------------- #

class GaussianPrior:
    """JAX/Pallas port of the PyTorch GaussianPrior module.

    forward() returns a lightweight distribution object whose log_prob /
    sample run Pallas TPU kernels (torch semantics: Independent(Normal, 1)).
    """

    def __init__(self, M):
        self.M = M
        # Deterministic parameter init, exactly as in the PyTorch module.
        self.mean = jnp.zeros((M,), dtype=jnp.float32)
        self.std = jnp.ones((M,), dtype=jnp.float32)

    class _IndependentNormal:
        def __init__(self, mean, std):
            self._mean = mean
            self._std = std

        def log_prob(self, z):
            return prior_log_prob(self._mean, self._std, z)

        def sample(self, eps):
            # Reparameterized sample given standard-normal noise eps (S, M).
            return prior_sample(self._mean, self._std, eps)

    def forward(self):
        return GaussianPrior._IndependentNormal(self.mean, self.std)

    __call__ = forward


# ---------------------------------- main ----------------------------------- #

if __name__ == "__main__":
    key = jax.random.PRNGKey(0)
    B, M = 2, 32  # small latent space, batch of 2

    prior = GaussianPrior(M)
    dist = prior()

    k1, k2, k3, k4 = jax.random.split(key, 4)
    z = jax.random.normal(k1, (B, M), dtype=jnp.float32)
    eps = jax.random.normal(k2, (B, M), dtype=jnp.float32)

    lp = dist.log_prob(z)
    samples = dist.sample(eps)
    jax.block_until_ready((lp, samples))

    # Cross-check against plain-JAX reference of the torch semantics.
    ref_lp = jnp.sum(
        -0.5 * ((z - prior.mean) / prior.std) ** 2
        - jnp.log(prior.std)
        - 0.5 * jnp.log(2.0 * jnp.pi),
        axis=-1,
    )
    assert lp.shape == (B,)
    assert samples.shape == (B, M)
    assert jnp.allclose(lp, ref_lp, atol=1e-5, rtol=1e-5)
    assert jnp.allclose(samples, prior.mean + prior.std * eps, atol=1e-6)

    # Exercise the multi-tile gridded path (padding + >1 grid step) as well.
    B2 = 1500
    z2 = jax.random.normal(k3, (B2, M), dtype=jnp.float32)
    eps2 = jax.random.normal(k4, (B2, M), dtype=jnp.float32)
    lp2 = dist.log_prob(z2)
    samples2 = dist.sample(eps2)
    jax.block_until_ready((lp2, samples2))
    ref_lp2 = jnp.sum(
        -0.5 * ((z2 - prior.mean) / prior.std) ** 2
        - jnp.log(prior.std)
        - 0.5 * jnp.log(2.0 * jnp.pi),
        axis=-1,
    )
    assert lp2.shape == (B2,)
    assert samples2.shape == (B2, M)
    assert jnp.allclose(lp2, ref_lp2, atol=1e-4, rtol=1e-5)
    assert jnp.allclose(samples2, prior.mean + prior.std * eps2, atol=1e-6)

    print("KERNEL_OK")
</pallas_src>

<mosaic_0001>
module attributes {stable_mosaic.version = 11 : i64} {
  func.func @_log_prob_kernel(%arg0: i32, %arg1: memref<1xf32, #tpu.memory_space<smem>>, %arg2: memref<1x32xf32, #tpu.memory_space<vmem>>, %arg3: memref<1x32xf32, #tpu.memory_space<vmem>>, %arg4: memref<8x32xf32, #tpu.memory_space<vmem>>, %arg5: memref<1x8xf32, #tpu.memory_space<vmem>>) attributes {dimension_semantics = [#tpu.dimension_semantics<parallel>], iteration_bounds = array<i64: 1>, scalar_prefetch = 0 : i64, scratch_operands = 0 : i64, tpu.core_type = #tpu.core_type<tc>, window_params = [{transform_indices = @transform_0, window_bounds = array<i64: 1>}, {pipeline_mode = #tpu.pipeline_mode<synchronous>, transform_indices = @transform_1, window_bounds = array<i64: 1, 32>}, {pipeline_mode = #tpu.pipeline_mode<synchronous>, transform_indices = @transform_2, window_bounds = array<i64: 1, 32>}, {transform_indices = @transform_3, window_bounds = array<i64: 8, 32>}, {transform_indices = @transform_4, window_bounds = array<i64: 1, 8>}]} {
    %c0 = arith.constant 0 : index
    %c0_0 = arith.constant 0 : index
    %0 = vector.load %arg4[%c0, %c0_0] : memref<8x32xf32, #tpu.memory_space<vmem>>, vector<8x32xf32>
    %c0_1 = arith.constant 0 : index
    %c0_2 = arith.constant 0 : index
    %1 = vector.load %arg2[%c0_1, %c0_2] : memref<1x32xf32, #tpu.memory_space<vmem>>, vector<1x32xf32>
    %2 = vector.broadcast %1 : vector<1x32xf32> to vector<8x32xf32>
    %3 = arith.subf %0, %2 : vector<8x32xf32>
    %c0_3 = arith.constant 0 : index
    %c0_4 = arith.constant 0 : index
    %4 = vector.load %arg3[%c0_3, %c0_4] : memref<1x32xf32, #tpu.memory_space<vmem>>, vector<1x32xf32>
    %5 = vector.broadcast %4 : vector<1x32xf32> to vector<8x32xf32>
    %6 = arith.mulf %3, %5 : vector<8x32xf32>
    %7 = arith.mulf %6, %6 : vector<8x32xf32>
    %cst = arith.constant 1.000000e+00 : f32
    %8 = vector.broadcast %cst : f32 to vector<1x32xf32>
    %cst_5 = arith.constant dense<0.000000e+00> : vector<1x8xf32>
    %9 = tpu.matmul %8, %7, %cst_5 {dimension_numbers = #tpu.dot_dimension_numbers<[1], [1], [0], [0], [0, 0, 1, 0], [], []>, precision = #tpu.contract_precision<fp32>} : vector<1x32xf32>, vector<8x32xf32>, vector<1x8xf32> -> vector<1x8xf32>
    %c0_6 = arith.constant 0 : index
    %10 = memref.load %arg1[%c0_6] : memref<1xf32, #tpu.memory_space<smem>>
    %cst_7 = arith.constant 5.000000e-01 : f32
    %11 = vector.broadcast %cst_7 : f32 to vector<1x8xf32>
    %12 = arith.mulf %11, %9 : vector<1x8xf32>
    %13 = vector.broadcast %10 : f32 to vector<1x8xf32>
    %14 = arith.subf %13, %12 : vector<1x8xf32>
    %c0_8 = arith.constant 0 : index
    %c0_9 = arith.constant 0 : index
    %15 = vector.load %arg5[%c0_8, %c0_9] : memref<1x8xf32, #tpu.memory_space<vmem>>, vector<1x8xf32>
    tpu.vector_store %arg5[%c0_8, %c0_9], %14 {strides = array<i32>} : memref<1x8xf32, #tpu.memory_space<vmem>>, vector<1x8xf32>,
    return
  }
  func.func @transform_0(%arg0: i32) -> i32 {
    %c0_i32 = arith.constant 0 : i32
    %c0_i32_0 = arith.constant 0 : i32
    return %c0_i32 : i32
  }
  func.func @transform_1(%arg0: i32) -> (i32, i32) {
    %c0_i32 = arith.constant 0 : i32
    %c0_i32_0 = arith.constant 0 : i32
    %c0_i32_1 = arith.constant 0 : i32
    return %c0_i32, %c0_i32_0 : i32, i32
  }
  func.func @transform_2(%arg0: i32) -> (i32, i32) {
    %c0_i32 = arith.constant 0 : i32
    %c0_i32_0 = arith.constant 0 : i32
    %c0_i32_1 = arith.constant 0 : i32
    return %c0_i32, %c0_i32_0 : i32, i32
  }
  func.func @transform_3(%arg0: i32) -> (i32, i32) {
    %c0_i32 = arith.constant 0 : i32
    %c0_i32_0 = arith.constant 0 : i32
    return %arg0, %c0_i32 : i32, i32
  }
  func.func @transform_4(%arg0: i32) -> (i32, i32) {
    %c0_i32 = arith.constant 0 : i32
    %c0_i32_0 = arith.constant 0 : i32
    return %c0_i32, %arg0 : i32, i32
  }
}

</mosaic_0001>

<bundles_post_ra>
// kernel: tpu_custom_call.1
= control target key start
LH: loop header
LB: loop body
LE: loop exit
PB: predicated region body
PF: predicated region fallthrough
CT: control target
= control target key end

     0   :  { %10 = vsyncpa [#allocation4], 0  ;;  %s331_s0 = inlined_call_operand.<no memory space> [shape: f32[1], index: 0, kind: input, shape index: {}]   ;;  %s332_s1 = inlined_call_operand.vmem [shape: f32[1,32], index: 1, kind: input, shape index: {}]   ;;  %s333_s2 = inlined_call_operand.vmem [shape: f32[1,32], index: 2, kind: input, shape index: {}]   ;;  %s334_s3 = inlined_call_operand.hbm [shape: f32[8,32], index: 3, kind: input, shape index: {}]   ;;  %s335_s4 = inlined_call_operand.hbm [shape: f32[1,8], index: 4, kind: output, shape index: {}]  }
   0x1   :  { %11 = vsyncpa [#allocation5], 0  ;;  %s23_s17 = sshll.u32 %s334_s3, 4  ;;  %s282_s18 = smov [#allocation3]   ;;  %s24_s17 = int_to_ptr.hbm [resolvable:$true] %s23_s17 }
   0x2   :  { %s25_s19 = sshll.u32 %s282_s18, 4  ;;  %s26_s19 = int_to_ptr.vmem [resolvable:$true] %s25_s19 }
   0x3   :  { %28 = dma.hbm_to_vmem [thread:$0]  %s24_s17, 128, %s26_s19, [#allocation4]  }
   0x4   :  { %278 = dma.done.wait [#allocation4], 128  }
   0x5   :  { %279 = vsyncadd [#allocation4], 4294967168  ;;  %vm45_vm0 = vcmask 261120   ;;  %v283_v0 = vmov 0   ;;  %v33_v3 = vld [vmem:[#allocation3] sm:$0xff]  ;;  %v284_v18 = vmov 1.0   ;;  %v200_v30 = vstv %s331_s0 }
   0x6   :  { %v47_v1 = vsel %vm45_vm0, 1.0, %v283_v0  ;;  %v228_v4 = vld [vmem:[%s332_s1] ss:$0 sm:$0xff]  ;;  %s285_s3 = smov [#allocation6]   ;;  %s211_s27 = sshll.u32 %s335_s4, 4  ;;  %vm202_vm1 = vcmask 57344   ;;  %s212_s27 = int_to_ptr.hbm [resolvable:$true] %s211_s27 }
   0x7   :  { %v70_v2 = vsub.f32 %v47_v1, %v47_v1  ;;  %v229_v5 = vld [vmem:[%s333_s2] ss:$0 sm:$0xff]  ;;  %v38_v6 = vsub.f32 %v33_v3, %v228_v4  ;;  %s209_s24 = sshll.u32 %s285_s3, 4  ;;  %s210_s24 = int_to_ptr.vmem [resolvable:$true] %s209_s24 }
   0x9   :  { %v71_v7 = vand.u32 4294901760, %v70_v2  ;;  %v43_v8 = vmul.f32 %v229_v5, %v38_v6 }
   0xb   :  { %v44_v9 = vmul.f32 %v43_v8, %v43_v8  ;;  %v72_v10 = vsub.f32 %v70_v2, %v71_v7 }
   0xd   :  { %v50_v11 = vsel %vm45_vm0, %v44_v9, 0  ;;  %v73_v13 = vand.u32 4294901760, %v72_v10 }
   0xe   :  { %v67_v12 = vand.u32 4294901760, %v50_v11 }
  0x10   :  { %v94_v14 = vsub.f32 %v50_v11, %v67_v12  ;;  %68 = vmatpush.xpose.msra.mxu0 %v67_v12  ;;  %144 = vmatpush.xpose.msra.mxu3 %v67_v12 }
  0x12   :  { %121 = vmatpush.xpose.msra.mxu2 %v94_v14  ;;  %v95_v15 = vand.u32 4294901760, %v94_v14 }
  0x13   :  { %74 = vmatmul.f32.vlgmr.msra.gmra.mxu0 %v73_v13  ;;  %148 = vmatmul.f32.vlgmr.msra.gmra.mxu3 %v71_v7 }
  0x14   :  { %v96_v16 = vsub.f32 %v94_v14, %v95_v15  ;;  %170 = vmatpush.xpose.msrb.mxu0 %v95_v15 }
  0x15   :  { %124 = vmatmul.f32.vlgmr.msra.gmra.mxu2 %v70_v2 }
  0x16   :  { %v97_v17 = vand.u32 4294901760, %v96_v16 }
  0x18   :  { %98 = vmatpush.xpose.msra.mxu1 %v97_v17 }
  0x1b   :  { %221 = vmatmul.msk.f32.vlgmr.msra.gmra.mxu1 %vm45_vm0, %v284_v18  ;;  %222 = vmatmul.msk.f32.vlgmr.msrb.gmra.mxu0 %vm45_vm0, %v284_v18 }
  0x1c   :  { %192 = vmatpush.xpose.msrb.mxu1 %v67_v12 }
  0x23   :  { %223 = vmatmul.msk.f32.vlgmr.msrb.gmra.mxu1 %vm45_vm0, %v284_v18 }
  0x90   :  { %v75_v19 = vpop.f32.mrf.mxu0 }
  0x96   :  { %v149_v23 = vpop.f32.mrf.mxu3 }
  0x98   :  { %v101_v20 = vpop.f32.mrf.mxu1  ;;  %v125_v21 = vpop.f32.mrf.mxu2 }
  0x99   :  { %v102_v22 = vadd.f32 %v101_v20, %v75_v19  ;;  %v173_v25 = vpop.f32.mrf.mxu0 }
  0x9b   :  { %v126_v24 = vadd.f32 %v125_v21, %v102_v22 }
  0x9d   :  { %v150_v26 = vadd.f32 %v149_v23, %v126_v24 }
  0x9f   :  { %v174_v27 = vadd.f32 %v173_v25, %v150_v26 }
  0xa0   :  { %v195_v28 = vpop.f32.mrf.mxu1 }
  0xa1   :  { %v196_v29 = vadd.f32 %v195_v28, %v174_v27 }
  0xa3   :  { %v199_v31 = vmul.f32 0.5, %v196_v29 }
  0xa5   :  { %v201_v32 = vsub.f32 %v200_v30, %v199_v31 }
  0xa7   :  { %203 = vst.msk [vmem:[#allocation6] sm:$0x1] %vm202_vm1, %v201_v32 }
  0xa8   :  { %214 = dma.vmem_to_hbm [thread:$0]  %s210_s24, 16, %s212_s27, [#allocation5]  }
  0xa9   :  { %280 = dma.done.wait [#allocation5], 16  }
  0xaa   :  { %281 = vsyncadd [#allocation5], 4294967280 }
  0xab   :  { %219 = vsyncpa [#allocation4], 1 }
  0xac   :  { %220 = vsyncpa [#allocation5], 1 }

</bundles_post_ra>
